<compile_context>
chip_gen: v7x
topology: tpu7x:2x2x1
jax: 0.10.0
libtpu: 0.0.40
codegen_flags: <defaults>
</compile_context>

<pallas_src>
import jax
import jax.numpy as jnp
from jax.experimental import pallas as pl
from jax.experimental.pallas import tpu as pltpu

IN_DIM = 12
HID_DIM = 64
OUT_DIM = 256


def mlp_kernel(x_ref, w1_ref, b1_ref, w2_ref, b2_ref, o_ref):
    # x_ref: (TB, 12)   w1_ref: (12, 64)   b1_ref: (1, 64)
    # w2_ref: (64, 256) b2_ref: (1, 256)   o_ref: (TB, 256)
    x = x_ref[...].astype(jnp.bfloat16)
    w1 = w1_ref[...].astype(jnp.bfloat16)
    h = jnp.dot(x, w1, preferred_element_type=jnp.float32) + b1_ref[...]
    h = jnp.maximum(h, 0.0)  # ReLU (f32)
    w2 = w2_ref[...].astype(jnp.bfloat16)
    y = jnp.dot(h.astype(jnp.bfloat16), w2,
                preferred_element_type=jnp.float32) + b2_ref[...]
    o_ref[...] = y.astype(o_ref.dtype)


def mlp_forward(x, w1, b1, w2, b2, *, tile_b=1024, out_dtype=None):
    """Fused MLP forward. Handles arbitrary batch size via tail padding."""
    B, Din = x.shape
    assert Din == IN_DIM
    out_dtype = x.dtype if out_dtype is None else out_dtype

    # Round the tile to a sublane multiple and clamp for tiny batches so we do
    # not over-pad small inputs.
    tile_b = max(8, ((tile_b + 7) // 8) * 8)
    tile_b = min(tile_b, ((B + 7) // 8) * 8)

    pad = (-B) % tile_b
    x_p = jnp.pad(x, ((0, pad), (0, 0))) if pad else x
    Bp = B + pad

    grid = (Bp // tile_b,)
    out = pl.pallas_call(
        mlp_kernel,
        out_shape=jax.ShapeDtypeStruct((Bp, OUT_DIM), out_dtype),
        grid_spec=pltpu.PrefetchScalarGridSpec(
            num_scalar_prefetch=0,
            grid=grid,
            in_specs=[
                pl.BlockSpec((tile_b, IN_DIM), lambda i: (i, 0)),    # x tile
                pl.BlockSpec((IN_DIM, HID_DIM), lambda i: (0, 0)),   # W1 (resident)
                pl.BlockSpec((1, HID_DIM), lambda i: (0, 0)),        # b1 (resident)
                pl.BlockSpec((HID_DIM, OUT_DIM), lambda i: (0, 0)),  # W2 (resident)
                pl.BlockSpec((1, OUT_DIM), lambda i: (0, 0)),        # b2 (resident)
            ],
            out_specs=pl.BlockSpec((tile_b, OUT_DIM), lambda i: (i, 0)),
        ),
        compiler_params=pltpu.CompilerParams(
            dimension_semantics=("parallel",),  # shard batch tiles across TCs (v7x)
        ),
    )(x_p, w1, b1, w2, b2)

    return out[:B] if pad else out


def init_params(key):
    """Deterministic params matching nn.Linear default init bounds."""
    k1, k2, k3, k4 = jax.random.split(key, 4)
    bound1 = 1.0 / jnp.sqrt(IN_DIM)
    bound2 = 1.0 / jnp.sqrt(HID_DIM)
    # stored as (in, out) = PyTorch weight.T
    w1 = jax.random.uniform(k1, (IN_DIM, HID_DIM), jnp.float32, -bound1, bound1)
    b1 = jax.random.uniform(k2, (1, HID_DIM), jnp.float32, -bound1, bound1)
    w2 = jax.random.uniform(k3, (HID_DIM, OUT_DIM), jnp.float32, -bound2, bound2)
    b2 = jax.random.uniform(k4, (1, OUT_DIM), jnp.float32, -bound2, bound2)
    return w1, b1, w2, b2


def _ref(x, w1, b1, w2, b2):
    return jnp.maximum(x @ w1 + b1, 0.0) @ w2 + b2


if __name__ == "__main__":
    key = jax.random.PRNGKey(0)
    kx1, kx2, kp = jax.random.split(key, 3)
    w1, b1, w2, b2 = init_params(kp)

    # Test 1: small, non-multiple-of-8 batch -> exercises tile clamp + padding.
    B1 = 13
    x1 = jax.random.normal(kx1, (B1, IN_DIM), jnp.float32)
    out1 = jax.block_until_ready(mlp_forward(x1, w1, b1, w2, b2))
    ref1 = _ref(x1, w1, b1, w2, b2)
    assert out1.shape == (B1, OUT_DIM)
    # bf16 MXU operands with f32 accumulation -> looser tolerance than pure f32.
    assert jnp.allclose(out1, ref1, atol=2e-2, rtol=2e-2)

    # Test 2: multi-step grid (parallel axis -> both TCs on v7x).
    B2 = 256
    x2 = jax.random.normal(kx2, (B2, IN_DIM), jnp.float32)
    out2 = jax.block_until_ready(mlp_forward(x2, w1, b1, w2, b2, tile_b=128))
    ref2 = _ref(x2, w1, b1, w2, b2)
    assert out2.shape == (B2, OUT_DIM)
    assert jnp.allclose(out2, ref2, atol=2e-2, rtol=2e-2)

    print("KERNEL_OK")
</pallas_src>

<mosaic_0001>
module attributes {stable_mosaic.version = 11 : i64} {
  func.func @mlp_kernel(%arg0: i32, %arg1: memref<16x12xf32, #tpu.memory_space<vmem>>, %arg2: memref<12x64xf32, #tpu.memory_space<vmem>>, %arg3: memref<1x64xf32, #tpu.memory_space<vmem>>, %arg4: memref<64x256xf32, #tpu.memory_space<vmem>>, %arg5: memref<1x256xf32, #tpu.memory_space<vmem>>, %arg6: memref<16x256xf32, #tpu.memory_space<vmem>>) attributes {dimension_semantics = [#tpu.dimension_semantics<parallel>], iteration_bounds = array<i64: 1>, scalar_prefetch = 0 : i64, scratch_operands = 0 : i64, tpu.core_type = #tpu.core_type<tc>, window_params = [{transform_indices = @transform_0, window_bounds = array<i64: 16, 12>}, {pipeline_mode = #tpu.pipeline_mode<synchronous>, transform_indices = @transform_1, window_bounds = array<i64: 12, 64>}, {pipeline_mode = #tpu.pipeline_mode<synchronous>, transform_indices = @transform_2, window_bounds = array<i64: 1, 64>}, {pipeline_mode = #tpu.pipeline_mode<synchronous>, transform_indices = @transform_3, window_bounds = array<i64: 64, 256>}, {pipeline_mode = #tpu.pipeline_mode<synchronous>, transform_indices = @transform_4, window_bounds = array<i64: 1, 256>}, {transform_indices = @transform_5, window_bounds = array<i64: 16, 256>}]} {
    %c0 = arith.constant 0 : index
    %c0_0 = arith.constant 0 : index
    %0 = vector.load %arg1[%c0, %c0_0] : memref<16x12xf32, #tpu.memory_space<vmem>>, vector<16x12xf32>
    %1 = arith.truncf %0 : vector<16x12xf32> to vector<16x12xbf16>
    %c0_1 = arith.constant 0 : index
    %c0_2 = arith.constant 0 : index
    %2 = vector.load %arg2[%c0_1, %c0_2] : memref<12x64xf32, #tpu.memory_space<vmem>>, vector<12x64xf32>
    %3 = arith.truncf %2 : vector<12x64xf32> to vector<12x64xbf16>
    %cst = arith.constant dense<0.000000e+00> : vector<16x64xf32>
    %4 = tpu.matmul %1, %3, %cst {dimension_numbers = #tpu.dot_dimension_numbers<[1], [0], [0], [1], [0, 0, 1, 1], [], []>} : vector<16x12xbf16>, vector<12x64xbf16>, vector<16x64xf32> -> vector<16x64xf32>
    %c0_3 = arith.constant 0 : index
    %c0_4 = arith.constant 0 : index
    %5 = vector.load %arg3[%c0_3, %c0_4] : memref<1x64xf32, #tpu.memory_space<vmem>>, vector<1x64xf32>
    %6 = vector.broadcast %5 : vector<1x64xf32> to vector<16x64xf32>
    %7 = arith.addf %4, %6 : vector<16x64xf32>
    %cst_5 = arith.constant 0.000000e+00 : f32
    %8 = vector.broadcast %cst_5 : f32 to vector<16x64xf32>
    %9 = arith.maximumf %7, %8 : vector<16x64xf32>
    %c0_6 = arith.constant 0 : index
    %c0_7 = arith.constant 0 : index
    %10 = vector.load %arg4[%c0_6, %c0_7] : memref<64x256xf32, #tpu.memory_space<vmem>>, vector<64x256xf32>
    %11 = arith.truncf %10 : vector<64x256xf32> to vector<64x256xbf16>
    %12 = arith.truncf %9 : vector<16x64xf32> to vector<16x64xbf16>
    %cst_8 = arith.constant dense<0.000000e+00> : vector<16x256xf32>
    %13 = tpu.matmul %12, %11, %cst_8 {dimension_numbers = #tpu.dot_dimension_numbers<[1], [0], [0], [1], [0, 0, 1, 1], [], []>} : vector<16x64xbf16>, vector<64x256xbf16>, vector<16x256xf32> -> vector<16x256xf32>
    %c0_9 = arith.constant 0 : index
    %c0_10 = arith.constant 0 : index
    %14 = vector.load %arg5[%c0_9, %c0_10] : memref<1x256xf32, #tpu.memory_space<vmem>>, vector<1x256xf32>
    %15 = vector.broadcast %14 : vector<1x256xf32> to vector<16x256xf32>
    %16 = arith.addf %13, %15 : vector<16x256xf32>
    %c0_11 = arith.constant 0 : index
    %c0_12 = arith.constant 0 : index
    %17 = vector.load %arg6[%c0_11, %c0_12] : memref<16x256xf32, #tpu.memory_space<vmem>>, vector<16x256xf32>
    tpu.vector_store %arg6[%c0_11, %c0_12], %16 {strides = array<i32>} : memref<16x256xf32, #tpu.memory_space<vmem>>, vector<16x256xf32>,
    return
  }
  func.func @transform_0(%arg0: i32) -> (i32, i32) {
    %c0_i32 = arith.constant 0 : i32
    %c0_i32_0 = arith.constant 0 : i32
    return %arg0, %c0_i32 : i32, i32
  }
  func.func @transform_1(%arg0: i32) -> (i32, i32) {
    %c0_i32 = arith.constant 0 : i32
    %c0_i32_0 = arith.constant 0 : i32
    %c0_i32_1 = arith.constant 0 : i32
    return %c0_i32, %c0_i32_0 : i32, i32
  }
  func.func @transform_2(%arg0: i32) -> (i32, i32) {
    %c0_i32 = arith.constant 0 : i32
    %c0_i32_0 = arith.constant 0 : i32
    %c0_i32_1 = arith.constant 0 : i32
    return %c0_i32, %c0_i32_0 : i32, i32
  }
  func.func @transform_3(%arg0: i32) -> (i32, i32) {
    %c0_i32 = arith.constant 0 : i32
    %c0_i32_0 = arith.constant 0 : i32
    %c0_i32_1 = arith.constant 0 : i32
    return %c0_i32, %c0_i32_0 : i32, i32
  }
  func.func @transform_4(%arg0: i32) -> (i32, i32) {
    %c0_i32 = arith.constant 0 : i32
    %c0_i32_0 = arith.constant 0 : i32
    %c0_i32_1 = arith.constant 0 : i32
    return %c0_i32, %c0_i32_0 : i32, i32
  }
  func.func @transform_5(%arg0: i32) -> (i32, i32) {
    %c0_i32 = arith.constant 0 : i32
    %c0_i32_0 = arith.constant 0 : i32
    return %arg0, %c0_i32 : i32, i32
  }
}

</mosaic_0001>

<bundles_post_ra>
// kernel: tpu_custom_call.1
= control target key start
LH: loop header
LB: loop body
LE: loop exit
PB: predicated region body
PF: predicated region fallthrough
CT: control target
= control target key end

     0   :  { %10 = vsyncpa [#allocation3], 0  ;;  %s457_s0 = inlined_call_operand.hbm [shape: f32[16,12], index: 0, kind: input, shape index: {}]   ;;  %s458_s1 = inlined_call_operand.hbm [shape: f32[12,64], index: 1, kind: input, shape index: {}]   ;;  %s459_s2 = inlined_call_operand.vmem [shape: f32[1,64], index: 2, kind: input, shape index: {}]   ;;  %s460_s3 = inlined_call_operand.hbm [shape: f32[64,256], index: 3, kind: input, shape index: {}]   ;;  %s461_s4 = inlined_call_operand.vmem [shape: f32[1,256], index: 4, kind: input, shape index: {}]   ;;  %s462_s5 = inlined_call_operand.hbm [shape: f32[16,256], index: 5, kind: output, shape index: {}]  }
   0x1   :  { %11 = vsyncpa [#allocation6], 0 }
   0x2   :  { %12 = vsyncpa [#allocation4], 0  ;;  %s349_s18 = smov [#allocation5]   ;;  %s350_s20 = smov [#allocation2]  }
   0x3   :  { %s30_s19 = sshll.u32 %s349_s18, 4  ;;  %s18_s21 = sshll.u32 %s350_s20, 4  ;;  %s31_s19 = int_to_ptr.vmem [resolvable:$true] %s30_s19  ;;  %s390_s21 = int_to_ptr.vmem [resolvable:$true] %s18_s21 }
   0x4   :  { %s255_s24 = scalar_lea.hbm %s458_s1, 256 }
   0x5   :  { %p256_p0 = scmp.ne.s32.totalorder %s458_s1, %s255_s24  ;;  %p259_p1 = scmp.lt.u32.totalorder %s255_s24, %s458_s1 }
   0x7   :  { %p261_p2 = pnand %p259_p1, %p256_p0 }
   0x9   :  { %264 = shalt.err (!%p261_p2)
}
   0xa   :  { %s265_s29 = scalar_lea.vmem %s31_s19, 256  ;;  %p270_p4 = scmp.lt.s32.totalorder %s31_s19, %s31_s19 }
   0xb   :  { %p266_p3 = scmp.ne.s32.totalorder %s31_s19, %s265_s29  ;;  %p271_p5 = scmp.lt.s32.totalorder %s265_s29, %s265_s29 }
   0xd   :  { %p272_p6 = por %p271_p5, %p270_p4 }
   0xf   :  { %p273_p7 = pnand %p272_p6, %p266_p3 }
  0x11   :  { %276 = shalt.err (!%p273_p7)
}
  0x12   :  { %s351_s30 = smov 128   ;;  %s352_s6 = smov 8  }
  0x13   :  { %36 = dma.hbm_to_vmem [thread:$0]  %s458_s1, 256, %s31_s19, [#allocation6], %s351_s30, %s351_s30, %s352_s6  }
  0x14   :  { %s277_s11 = scalar_lea.hbm %s457_s0, 256 }
  0x15   :  { %p278_p8 = scmp.ne.s32.totalorder %s457_s0, %s277_s11  ;;  %p281_p9 = scmp.lt.u32.totalorder %s277_s11, %s457_s0 }
  0x17   :  { %p283_p10 = pnand %p281_p9, %p278_p8 }
  0x19   :  { %286 = shalt.err (!%p283_p10)
}
  0x1a   :  { %s287_s16 = scalar_lea.vmem %s390_s21, 256  ;;  %p292_p12 = scmp.lt.s32.totalorder %s390_s21, %s390_s21 }
  0x1b   :  { %p288_p11 = scmp.ne.s32.totalorder %s390_s21, %s287_s16  ;;  %p293_p13 = scmp.lt.s32.totalorder %s287_s16, %s287_s16 }
  0x1d   :  { %p294_p0 = por %p293_p13, %p292_p12 }
  0x1f   :  { %p295_p1 = pnand %p294_p0, %p288_p11 }
  0x21   :  { %298 = shalt.err (!%p295_p1)
}
  0x22   :  { %24 = dma.hbm_to_vmem [thread:$0]  %s457_s0, 256, %s390_s21, [#allocation3], %s351_s30, %s351_s30, %s352_s6  }
  0x23   :  { %s353_s18 = smov [#allocation7]   ;;  %s299_s23 = scalar_lea.hbm %s460_s3, 2048 }
  0x24   :  { %s44_s19 = sshll.u32 %s353_s18, 4  ;;  %p300_p2 = scmp.ne.s32.totalorder %s460_s3, %s299_s23  ;;  %s45_s19 = int_to_ptr.vmem [resolvable:$true] %s44_s19 }
  0x25   :  { %p303_p3 = scmp.lt.u32.totalorder %s299_s23, %s460_s3 }
  0x27   :  { %p305_p4 = pnand %p303_p3, %p300_p2 }
  0x29   :  { %308 = shalt.err (!%p305_p4)
}
  0x2a   :  { %s309_s28 = scalar_lea.vmem %s45_s19, 2048  ;;  %p314_p6 = scmp.lt.s32.totalorder %s45_s19, %s45_s19 }
  0x2b   :  { %p310_p5 = scmp.ne.s32.totalorder %s45_s19, %s309_s28  ;;  %p315_p7 = scmp.lt.s32.totalorder %s309_s28, %s309_s28 }
  0x2d   :  { %p316_p8 = por %p315_p7, %p314_p6 }
  0x2f   :  { %p317_p9 = pnand %p316_p8, %p310_p5 }
  0x31   :  { %320 = shalt.err (!%p317_p9)
}
  0x32   :  { %s354_s0 = smov 256   ;;  %s355_s21 = smov 16  }
  0x33   :  { %50 = dma.hbm_to_vmem [thread:$0]  %s460_s3, 2048, %s45_s19, [#allocation6], %s354_s0, %s354_s0, %s355_s21  }
  0x34   :  { %343 = dma.done.wait [#allocation3], 256  }
  0x35   :  { %344 = vsyncadd [#allocation3], 4294967040 }
  0x36   :  { %345 = dma.done.wait [#allocation6], 2304  }
  0x37   :  { %346 = vsyncadd [#allocation6], 4294964992  ;;  %v356_v0 = vmov 0.0   ;;  %vm357_vm0 = vmmov 0   ;;  %v66_v1 = vld [vmem:[#allocation5] sm:$0xff]  ;;  %vm80_vm1 = vcmask 1045504   ;;  %v154_v43 = vlaneseq }
  0x38   :  { %238 = vmatprep.subr.bf16.mxu0 %v356_v0  ;;  %240 = vmatprep.mubr.msk.bf16.mxu0 %vm357_vm0, %v356_v0  ;;  %v67_v2 = vld [vmem:[#allocation5 + $0x8] sm:$0xf]  ;;  %v63_v3 = vld [vmem:[#allocation2] sm:$0xff]  ;;  %v64_v5 = vld [vmem:[#allocation2 + $0x8] sm:$0xff]  ;;  %vm76_vm2 = vcmask 97280   ;;  %v358_v32 = vmov 0  }
  0x39   :  { %v68_v4 = vpack.c.bf16 %v67_v2, %v66_v1  ;;  %v128_v6 = vld [vmem:[#allocation7 + $0x8] sm:$0xff]  ;;  %v130_v7 = vld [vmem:[#allocation7 + $0x18] sm:$0xff]  ;;  %v127_v9 = vld [vmem:[#allocation7] sm:$0xff]  ;;  %v65_v13 = vpack.c.bf16 %v64_v5, %v63_v3  ;;  %200 = vmatprep.mubr.bf16.mxu1 %v358_v32  ;;  %vm164_vm3 = vcmask 523264   ;;  %v155_v44 = vshrl.u32 %v154_v43, 7 }
  0x3a   :  { %v144_v8 = vpack.c.bf16 %v130_v7, %v128_v6  ;;  %v129_v10 = vld [vmem:[#allocation7 + $0x10] sm:$0xff]  ;;  %v132_v11 = vld [vmem:[#allocation7 + $0x28] sm:$0xff]  ;;  %v134_v15 = vld [vmem:[#allocation7 + $0x38] sm:$0xff] }
  0x3b   :  { %v82_v12 = vsel %vm80_vm1, %v68_v4, 0  ;;  %v143_v14 = vpack.c.bf16 %v129_v10, %v127_v9  ;;  %v131_v16 = vld [vmem:[#allocation7 + $0x20] sm:$0xff]  ;;  %v133_v17 = vld [vmem:[#allocation7 + $0x30] sm:$0xff]  ;;  %v146_v18 = vpack.c.bf16 %v134_v15, %v132_v11  ;;  %v136_v20 = vld [vmem:[#allocation7 + $0x48] sm:$0xff]  ;;  %v156_v45 = vsub.s32 0, %v155_v44 }
  0x3c   :  { %239 = vmatpush3.bf16.msra.mxu0 %v82_v12  ;;  %168 = vmatprep.subr.bf16.mxu1 %v144_v8  ;;  %v145_v19 = vpack.c.bf16 %v133_v17, %v131_v16  ;;  %v138_v21 = vld [vmem:[#allocation7 + $0x58] sm:$0xff]  ;;  %v135_v23 = vld [vmem:[#allocation7 + $0x40] sm:$0xff]  ;;  %v137_v24 = vld [vmem:[#allocation7 + $0x50] sm:$0xff]  ;;  %v160_v47 = vsub.s32 1, %v155_v44 }
  0x3d   :  { %169 = vmatpush1.bf16.msra.mxu1 %v143_v14  ;;  %v148_v22 = vpack.c.bf16 %v138_v21, %v136_v20  ;;  %v147_v25 = vpack.c.bf16 %v137_v24, %v135_v23  ;;  %v140_v26 = vld [vmem:[#allocation7 + $0x68] sm:$0xff]  ;;  %v142_v27 = vld [vmem:[#allocation7 + $0x78] sm:$0xff]  ;;  %v139_v29 = vld [vmem:[#allocation7 + $0x60] sm:$0xff] }
  0x3e   :  { %170 = vmatprep.subr.bf16.mxu1 %v146_v18  ;;  %v150_v28 = vpack.c.bf16 %v142_v27, %v140_v26  ;;  %v141_v30 = vld [vmem:[#allocation7 + $0x70] sm:$0xff]  ;;  %v233_v33 = vld [vmem:[%s459_s2] ss:$0 sm:$0xff]  ;;  %s359_s2 = smov [#allocation8]  }
  0x3f   :  { %241 = vmatmul.mubr.msk.bf16.vlgmr.msra.gmra.mrb[0].mxu0 %vm76_vm2, %v65_v13  ;;  %v149_v31 = vpack.c.bf16 %v141_v30, %v139_v29  ;;  %v152_v46 = vld [vmem:[%s461_s4] sm:$0x3]  ;;  %s220_s9 = sshll.u32 %s359_s2, 4  ;;  %s221_s9 = int_to_ptr.vmem [resolvable:$true] %s220_s9 }
  0x40   :  { %v157_v48 = vrot.slane %v152_v46, %v156_v45  ;;  %v161_v49 = vrot.slane %v152_v46, %v160_v47  ;;  %s321_s10 = scalar_lea.vmem %s221_s9, 512  ;;  %p326_p11 = scmp.lt.s32.totalorder %s221_s9, %s221_s9 }
  0x41   :  { %171 = vmatpush1.bf16.msra.mxu1 %v145_v19  ;;  %p322_p10 = scmp.ne.s32.totalorder %s221_s9, %s321_s10  ;;  %p327_p12 = scmp.lt.s32.totalorder %s321_s10, %s321_s10 }
  0x42   :  { %172 = vmatprep.subr.bf16.mxu1 %v148_v22 }
  0x43   :  { %p328_p13 = por %p327_p12, %p326_p11 }
  0x45   :  { %173 = vmatpush1.bf16.msra.mxu1 %v147_v25  ;;  %p329_p0 = pnand %p328_p13, %p322_p10 }
  0x46   :  { %174 = vmatprep.subr.bf16.mxu1 %v150_v28 }
  0x49   :  { %175 = vmatpush1.bf16.msra.mxu1 %v149_v31 }
 0x112   :  { %v118_v34 = vpop.f32.mrb[0].mxu0 }
 0x113   :  { %v119_v35 = vadd.f32 %v233_v33, %v118_v34  ;;  %v242_v36 = vpop.f32.mrb[1].mxu0 }
 0x114   :  { %v121_v37 = vpop.f32.mrb[2].mxu0 }
 0x115   :  { %v122_v38 = vadd.f32 %v233_v33, %v121_v37  ;;  %v243_v39 = vpop.f32.mrb[3].mxu0  ;;  %v125_v40 = vmax.f32 %v119_v35, 0.0 }
 0x117   :  { %v126_v41 = vmax.f32 %v122_v38, 0.0 }
 0x119   :  { %v151_v42 = vpack.c.bf16 %v126_v41, %v125_v40 }
 0x11b   :  { %235 = vmatmul.mubr.msk.bf16.vlgmr.msra.gmra.mrb[0].mxu1 %vm164_vm3, %v151_v42 }
 0x1ee   :  { %v202_v50 = vpop.f32.mrb[0].mxu1 }
 0x1ef   :  { %v203_v51 = vadd.f32 %v202_v50, %v157_v48  ;;  %v204_v52 = vpop.f32.mrb[1].mxu1 }
 0x1f0   :  { %v205_v53 = vadd.f32 %v204_v52, %v161_v49  ;;  %v206_v54 = vpop.f32.mrb[2].mxu1 }
 0x1f1   :  { %211 = vst [vmem:[#allocation8] sm:$0xff] %v203_v51  ;;  %v207_v55 = vadd.f32 %v206_v54, %v157_v48  ;;  %v208_v56 = vpop.f32.mrb[3].mxu1 }
 0x1f2   :  { %212 = vst [vmem:[#allocation8 + $0x8] sm:$0xff] %v205_v53  ;;  %v209_v57 = vadd.f32 %v208_v56, %v161_v49 }
 0x1f3   :  { %213 = vst [vmem:[#allocation8 + $0x10] sm:$0xff] %v207_v55 }
 0x1f4   :  { %214 = vst [vmem:[#allocation8 + $0x18] sm:$0xff] %v209_v57 }
 0x1f5   :  { %332 = shalt.err (!%p329_p0)
}
 0x1f6   :  { %s333_s12 = scalar_lea.hbm %s462_s5, 512 }
 0x1f7   :  { %p334_p1 = scmp.ne.s32.totalorder %s462_s5, %s333_s12  ;;  %p337_p2 = scmp.lt.u32.totalorder %s333_s12, %s462_s5 }
 0x1f9   :  { %p339_p3 = pnand %p337_p2, %p334_p1 }
 0x1fb   :  { %342 = shalt.err (!%p339_p3)
}
 0x1fc   :  { %226 = dma.vmem_to_hbm [thread:$0]  %s221_s9, 512, %s462_s5, [#allocation4], %s354_s0, %s354_s0, %s355_s21  }
 0x1fd   :  { %347 = dma.done.wait [#allocation4], 512  }
 0x1fe   :  { %348 = vsyncadd [#allocation4], 4294966784 }
 0x1ff   :  { %230 = vsyncpa [#allocation3], 1 }
 0x200   :  { %231 = vsyncpa [#allocation6], 1 }
 0x201   :  { %232 = vsyncpa [#allocation4], 1 }

</bundles_post_ra>
